<compile_context>
chip_gen: v7x
topology: tpu7x:2x2x1
jax: 0.10.0
libtpu: 0.0.40
codegen_flags: <defaults>
</compile_context>

<pallas_src>
import functools

import jax
import jax.numpy as jnp
from jax import lax
from jax.experimental import pallas as pl
from jax.experimental.pallas import tpu as pltpu

_PACKED_LANES = 128  # lane width of the packed channels_last view


def _round_up(x, m):
    return (x + m - 1) // m * m


def _cdiv(a, b):
    return -(-a // b)


@functools.lru_cache(maxsize=None)
def _tpu_generation():
    """Best-effort TPU generation (7 for v7x, 6 for v6e, 5 for v5e/p, ...)."""
    try:
        kind = jax.devices()[0].device_kind.lower()
    except Exception:
        return 0
    for gen in (7, 6, 5, 4, 3, 2):
        if f"v{gen}" in kind or f"tpu{gen}" in kind:
            return gen
    return 0


@functools.lru_cache(maxsize=None)
def _budgets():
    """(per-block HBM payload bytes, scoped VMEM limit bytes) per generation."""
    gen = _tpu_generation()
    if gen >= 7:
        # ~3.2 TB/s HBM but only 64 MiB VMEM per TensorCore: 4 MiB blocks keep
        # double-buffered in+out plus f32 temporaries safely under 48 MiB.
        return 4 * 1024 * 1024, 48 * 1024 * 1024
    if gen == 6:
        # ~1.4 TB/s HBM, 128 MiB VMEM: 4 MiB blocks halve per-step overhead.
        return 4 * 1024 * 1024, 64 * 1024 * 1024
    # v5e and older / unknown: ~0.8 TB/s; the explicit 32 MiB scoped limit is
    # what makes 2 MiB blocks legal there (default scoped VMEM is 16 MiB).
    return 2 * 1024 * 1024, 32 * 1024 * 1024


@functools.lru_cache(maxsize=None)
def _min_grid_steps():
    # v7x has two TensorCores: ensure "parallel" grid axes have enough steps
    # to feed both and to overlap DMA with compute.  Single-TC chips keep
    # single-block execution for small inputs (per-step overhead).
    return 8 if _tpu_generation() >= 7 else 1


@functools.lru_cache(maxsize=None)
def _roll_shifts_forward():
    """True if pltpu.roll(x, s)[..., i] == x[..., i - s] (np.roll convention).

    One-time, cached probe so the packed path's butterfly selection is robust
    to the rotation direction convention.
    """
    def probe(x_ref, o_ref):
        o_ref[...] = pltpu.roll(x_ref[...], shift=1, axis=1)

    x = jnp.broadcast_to(lax.iota(jnp.int32, 128)[None, :], (8, 128))
    y = pl.pallas_call(
        probe, out_shape=jax.ShapeDtypeStruct((8, 128), jnp.int32))(x)
    return int(y[0, 1]) == 0


# ---------------------------------------------------------------------------
# Kernels
# ---------------------------------------------------------------------------
def _ln_lastdim_kernel(x_ref, w_ref, b_ref, o_ref, *, eps):
    """Normalize every row of a (TM, C) tile over the lane (C) axis."""
    x = x_ref[...].astype(jnp.float32)                  # (TM, C)
    mean = jnp.mean(x, axis=-1, keepdims=True)
    xc = x - mean
    var = jnp.mean(xc * xc, axis=-1, keepdims=True)     # biased variance
    inv = lax.rsqrt(var + eps)
    w = w_ref[...].astype(jnp.float32)                  # (1, C)
    b = b_ref[...].astype(jnp.float32)
    o_ref[...] = (xc * inv * w + b).astype(o_ref.dtype)


def _segment_allreduce_sum(x, seg, roll_forward):
    """Sum each aligned group of `seg` lanes of x (TM, W) and broadcast the
    sum back to every lane of its group.  `seg` is a power of two dividing
    128, so groups never straddle segment/vreg boundaries; log2(seg) XLU
    rolls + VPU selects."""
    w = x.shape[-1]
    lane = lax.broadcasted_iota(jnp.int32, (1, w), 1)
    acc = x
    s = 1
    while s < seg:
        a = pltpu.roll(acc, shift=s, axis=1)
        b = pltpu.roll(acc, shift=w - s, axis=1)
        # lo[i] = acc[i - s], hi[i] = acc[i + s] regardless of convention.
        lo, hi = (a, b) if roll_forward else (b, a)
        pick_hi = ((lane & s) == 0).astype(jnp.float32)   # partner = lane XOR s
        acc = acc + pick_hi * hi + (1.0 - pick_hi) * lo
        s *= 2
    return acc


def _ln_lastdim_packed_kernel(x_ref, w_ref, b_ref, o_ref, *, eps, c,
                              roll_forward):
    """Lane-dense channels_last: every aligned group of `c` lanes of the
    (TM, 128) tile is one logical LayerNorm row."""
    x = x_ref[...].astype(jnp.float32)                   # (TM, 128)
    inv_c = 1.0 / c
    mean = _segment_allreduce_sum(x, c, roll_forward) * inv_c
    xc = x - mean
    var = _segment_allreduce_sum(xc * xc, c, roll_forward) * inv_c
    inv = lax.rsqrt(var + eps)
    w = w_ref[...].astype(jnp.float32)                   # (1, 128), tiled
    b = b_ref[...].astype(jnp.float32)
    o_ref[...] = (xc * inv * w + b).astype(o_ref.dtype)


def _ln_chanfirst_kernel(x_ref, w_ref, b_ref, o_ref, *, eps):
    """Normalize every spatial column of a (1, C, TS) tile over the C axis."""
    x = x_ref[0].astype(jnp.float32)                     # (C, TS)
    mean = jnp.mean(x, axis=0, keepdims=True)
    xc = x - mean
    var = jnp.mean(xc * xc, axis=0, keepdims=True)       # biased variance
    inv = lax.rsqrt(var + eps)
    w = w_ref[...].astype(jnp.float32)                   # (C, 1)
    b = b_ref[...].astype(jnp.float32)
    o_ref[0] = (xc * inv * w + b).astype(o_ref.dtype)


# ---------------------------------------------------------------------------
# Wrappers
# ---------------------------------------------------------------------------
def _layer_norm_channels_last(x, weight, bias, eps, *, block_rows=None):
    c = x.shape[-1]
    lead = x.shape[:-1]
    rows = 1
    for d in lead:
        rows *= d
    payload, vmem_limit = _budgets()
    itemsize = x.dtype.itemsize
    min_steps = _min_grid_steps()

    packed = (c >= 1 and (c & (c - 1)) == 0 and c < _PACKED_LANES
              and (rows * c) % _PACKED_LANES == 0)

    if packed:
        # Lane-dense flat view (R, 128); each row holds 128//c logical rows.
        # Every 128-lane row is fully real data (rows*c % 128 == 0), so the
        # reduction segments are always in-bounds; only whole rows of the
        # ragged last block are OOB (garbage whose writes are dropped).
        r2 = (rows * c) // _PACKED_LANES
        x2d = x.reshape(r2, _PACKED_LANES)
        reps = _PACKED_LANES // c
        w2d = jnp.tile(weight.reshape(1, c), (1, reps))
        b2d = jnp.tile(bias.reshape(1, c), (1, reps))

        if block_rows is not None:
            tm = _round_up(max(1, (block_rows * c) // _PACKED_LANES), 8)
        else:
            tm_budget = max(8, (payload // (_PACKED_LANES * itemsize)) // 8 * 8)
            tm_split = _round_up(_cdiv(r2, min_steps), 8)
            tm = max(8, min(tm_budget, tm_split))
        if tm >= r2:
            tm = r2
        grid = (_cdiv(r2, tm),)

        out = pl.pallas_call(
            functools.partial(_ln_lastdim_packed_kernel, eps=eps, c=c,
                              roll_forward=_roll_shifts_forward()),
            out_shape=jax.ShapeDtypeStruct((r2, _PACKED_LANES), x.dtype),
            grid_spec=pltpu.PrefetchScalarGridSpec(
                num_scalar_prefetch=0,
                grid=grid,
                in_specs=[
                    pl.BlockSpec((tm, _PACKED_LANES), lambda i: (i, 0)),
                    pl.BlockSpec((1, _PACKED_LANES), lambda i: (0, 0)),
                    pl.BlockSpec((1, _PACKED_LANES), lambda i: (0, 0)),
                ],
                out_specs=pl.BlockSpec((tm, _PACKED_LANES), lambda i: (i, 0)),
            ),
            compiler_params=pltpu.CompilerParams(
                dimension_semantics=("parallel",),
                vmem_limit_bytes=vmem_limit),
        )(x2d, w2d, b2d)
        return out.reshape(x.shape)

    # General fallback: (rows, C) tiles with C on lanes.
    x2d = x.reshape(rows, c)
    if block_rows is None:
        # Budget against the lane-padded f32 VMEM footprint (conservative).
        bytes_per_row = _round_up(c, 128) * 4
        block_rows = max(8, (payload // bytes_per_row) // 8 * 8)
        block_rows = min(block_rows, _round_up(_cdiv(rows, min_steps), 8))
        block_rows = max(block_rows, 8)
    tm = rows if block_rows >= rows else _round_up(block_rows, 8)
    if tm >= rows:
        tm = rows
    grid = (_cdiv(rows, tm),)

    out = pl.pallas_call(
        functools.partial(_ln_lastdim_kernel, eps=eps),
        out_shape=jax.ShapeDtypeStruct((rows, c), x.dtype),
        grid_spec=pltpu.PrefetchScalarGridSpec(
            num_scalar_prefetch=0,
            grid=grid,
            in_specs=[
                pl.BlockSpec((tm, c), lambda i: (i, 0)),
                pl.BlockSpec((1, c), lambda i: (0, 0)),
                pl.BlockSpec((1, c), lambda i: (0, 0)),
            ],
            out_specs=pl.BlockSpec((tm, c), lambda i: (i, 0)),
        ),
        compiler_params=pltpu.CompilerParams(
            dimension_semantics=("parallel",),
            vmem_limit_bytes=vmem_limit),
    )(x2d, weight.reshape(1, c), bias.reshape(1, c))
    return out.reshape(*lead, c)


def _layer_norm_channels_first(x, weight, bias, eps, *, block_spatial=None):
    bsz, c, h, w = x.shape
    s = h * w
    x3 = x.reshape(bsz, c, s)            # contiguous trailing dims -> free
    payload, vmem_limit = _budgets()
    itemsize = x.dtype.itemsize
    min_steps = _min_grid_steps()

    if block_spatial is None:
        bytes_per_col = _round_up(c, 8) * itemsize       # C sits on sublanes
        block_spatial = max(128, (payload // bytes_per_col) // 128 * 128)
        spatial_splits = max(1, _cdiv(min_steps, bsz))
        block_spatial = min(block_spatial,
                            _round_up(_cdiv(s, spatial_splits), 128))
        block_spatial = max(block_spatial, 128)
    ts = s if block_spatial >= s else _round_up(block_spatial, 128)
    if ts >= s:
        ts = s
    grid = (bsz, _cdiv(s, ts))

    out = pl.pallas_call(
        functools.partial(_ln_chanfirst_kernel, eps=eps),
        out_shape=jax.ShapeDtypeStruct((bsz, c, s), x.dtype),
        grid_spec=pltpu.PrefetchScalarGridSpec(
            num_scalar_prefetch=0,
            grid=grid,
            in_specs=[
                pl.BlockSpec((1, c, ts), lambda bi, si: (bi, 0, si)),
                pl.BlockSpec((c, 1), lambda bi, si: (0, 0)),
                pl.BlockSpec((c, 1), lambda bi, si: (0, 0)),
            ],
            out_specs=pl.BlockSpec((1, c, ts), lambda bi, si: (bi, 0, si)),
        ),
        compiler_params=pltpu.CompilerParams(
            dimension_semantics=("parallel", "parallel"),
            vmem_limit_bytes=vmem_limit),
    )(x3, weight.reshape(c, 1), bias.reshape(c, 1))
    return out.reshape(bsz, c, h, w)


def layer_norm(x, weight, bias, eps=1e-6, data_format="channels_last",
               *, block_rows=None, block_spatial=None):
    """Matches the PyTorch LayerNorm module's forward semantics."""
    if data_format not in ("channels_last", "channels_first"):
        raise NotImplementedError
    if data_format == "channels_last":
        return _layer_norm_channels_last(x, weight, bias, eps,
                                         block_rows=block_rows)
    return _layer_norm_channels_first(x, weight, bias, eps,
                                      block_spatial=block_spatial)


# ---------------------------------------------------------------------------
# Reference + tests
# ---------------------------------------------------------------------------
def _ref_layer_norm(x, weight, bias, eps, data_format):
    x32 = x.astype(jnp.float32)
    if data_format == "channels_last":
        u = jnp.mean(x32, axis=-1, keepdims=True)
        s = jnp.mean((x32 - u) ** 2, axis=-1, keepdims=True)
        y = (x32 - u) / jnp.sqrt(s + eps)
        return (y * weight + bias).astype(x.dtype)
    else:
        u = jnp.mean(x32, axis=1, keepdims=True)
        s = jnp.mean((x32 - u) ** 2, axis=1, keepdims=True)
        y = (x32 - u) / jnp.sqrt(s + eps)
        return (weight[None, :, None, None] * y
                + bias[None, :, None, None]).astype(x.dtype)


if __name__ == "__main__":
    key = jax.random.PRNGKey(0)
    k1, k2, k3, k4, k5, k6, k7, k8 = jax.random.split(key, 8)

    C = 4
    eps = 1e-6
    weight = (jnp.ones((C,), jnp.float32)
              + 0.1 * jax.random.normal(k3, (C,), jnp.float32))
    bias = 0.1 * jax.random.normal(k4, (C,), jnp.float32)

    # channels_first: NCHW, auto tiling.
    x_cf = jax.random.normal(k1, (2, C, 16, 16), jnp.float32)
    y_cf = jax.block_until_ready(
        layer_norm(x_cf, weight, bias, eps, data_format="channels_first"))
    ref_cf = _ref_layer_norm(x_cf, weight, bias, eps, "channels_first")
    assert jnp.allclose(y_cf, ref_cf, atol=1e-5, rtol=1e-5)

    # channels_last: NHWC, auto tiling -> lane-dense packed path (C=4).
    x_cl = jax.random.normal(k2, (2, 16, 16, C), jnp.float32)
    y_cl = jax.block_until_ready(
        layer_norm(x_cl, weight, bias, eps, data_format="channels_last"))
    ref_cl = _ref_layer_norm(x_cl, weight, bias, eps, "channels_last")
    assert jnp.allclose(y_cl, ref_cl, atol=1e-5, rtol=1e-5)

    # Packed path with a forced small block -> ragged last block.
    x_cl_r = jax.random.normal(k5, (2, 10, 16, C), jnp.float32)
    y_cl_r = jax.block_until_ready(
        layer_norm(x_cl_r, weight, bias, eps, data_format="channels_last",
                   block_rows=128))
    ref_cl_r = _ref_layer_norm(x_cl_r, weight, bias, eps, "channels_last")
    assert jnp.allclose(y_cl_r, ref_cl_r, atol=1e-5, rtol=1e-5)

    # rows*C not divisible by 128 -> general fallback path, ragged last block.
    x_cl2 = jax.random.normal(k6, (3, 7, 11, C), jnp.float32)
    y_cl2 = jax.block_until_ready(
        layer_norm(x_cl2, weight, bias, eps, data_format="channels_last",
                   block_rows=64))
    ref_cl2 = _ref_layer_norm(x_cl2, weight, bias, eps, "channels_last")
    assert jnp.allclose(y_cl2, ref_cl2, atol=1e-5, rtol=1e-5)

    # channels_first with a forced small spatial block -> ragged last block.
    x_cf2 = jax.random.normal(k7, (2, C, 18, 13), jnp.float32)
    y_cf2 = jax.block_until_ready(
        layer_norm(x_cf2, weight, bias, eps, data_format="channels_first",
                   block_spatial=128))
    ref_cf2 = _ref_layer_norm(x_cf2, weight, bias, eps, "channels_first")
    assert jnp.allclose(y_cf2, ref_cf2, atol=1e-5, rtol=1e-5)

    # bf16 input exercises dtype-aware block sizing on the packed path.
    x_bf = jax.random.normal(k8, (2, 16, 16, C), jnp.float32).astype(jnp.bfloat16)
    y_bf = jax.block_until_ready(
        layer_norm(x_bf, weight, bias, eps, data_format="channels_last"))
    ref_bf = _ref_layer_norm(x_bf, weight, bias, eps, "channels_last")
    assert jnp.allclose(y_bf.astype(jnp.float32), ref_bf.astype(jnp.float32),
                        atol=3e-2, rtol=3e-2)

    print("KERNEL_OK")
</pallas_src>

<mosaic_0001>
module attributes {stable_mosaic.version = 11 : i64} {
  func.func @_ln_chanfirst_kernel(%arg0: i32, %arg1: i32, %arg2: memref<1x4x256xf32, #tpu.memory_space<vmem>>, %arg3: memref<4x1xf32, #tpu.memory_space<vmem>>, %arg4: memref<4x1xf32, #tpu.memory_space<vmem>>, %arg5: memref<1x4x256xf32, #tpu.memory_space<vmem>>) attributes {dimension_semantics = [#tpu.dimension_semantics<parallel>, #tpu.dimension_semantics<parallel>], iteration_bounds = array<i64: 2, 1>, scalar_prefetch = 0 : i64, scratch_operands = 0 : i64, tpu.core_type = #tpu.core_type<tc>, window_params = [{transform_indices = @transform_0, window_bounds = array<i64: 1, 4, 256>}, {pipeline_mode = #tpu.pipeline_mode<synchronous>, transform_indices = @transform_1, window_bounds = array<i64: 4, 1>}, {pipeline_mode = #tpu.pipeline_mode<synchronous>, transform_indices = @transform_2, window_bounds = array<i64: 4, 1>}, {transform_indices = @transform_3, window_bounds = array<i64: 1, 4, 256>}]} {
    %c0 = arith.constant 0 : index
    %c0_0 = arith.constant 0 : index
    %c0_1 = arith.constant 0 : index
    %0 = vector.load %arg2[%c0, %c0_0, %c0_1] : memref<1x4x256xf32, #tpu.memory_space<vmem>>, vector<1x4x256xf32>
    %1 = vector.shape_cast %0 : vector<1x4x256xf32> to vector<4x256xf32>
    %cst = arith.constant dense<0.000000e+00> : vector<256xf32>
    %2 = vector.multi_reduction <add>, %1, %cst [0] : vector<4x256xf32> to vector<256xf32>
    %3 = vector.shape_cast %2 : vector<256xf32> to vector<1x256xf32>
    %cst_2 = arith.constant 4.000000e+00 : f32
    %4 = vector.broadcast %cst_2 : f32 to vector<1x256xf32>
    %5 = arith.divf %3, %4 : vector<1x256xf32>
    %6 = vector.broadcast %5 : vector<1x256xf32> to vector<4x256xf32>
    %7 = arith.subf %1, %6 : vector<4x256xf32>
    %8 = arith.mulf %7, %7 : vector<4x256xf32>
    %cst_3 = arith.constant dense<0.000000e+00> : vector<256xf32>
    %9 = vector.multi_reduction <add>, %8, %cst_3 [0] : vector<4x256xf32> to vector<256xf32>
    %10 = vector.shape_cast %9 : vector<256xf32> to vector<1x256xf32>
    %cst_4 = arith.constant 4.000000e+00 : f32
    %11 = vector.broadcast %cst_4 : f32 to vector<1x256xf32>
    %12 = arith.divf %10, %11 : vector<1x256xf32>
    %cst_5 = arith.constant 9.99999997E-7 : f32
    %13 = vector.broadcast %cst_5 : f32 to vector<1x256xf32>
    %14 = arith.addf %12, %13 : vector<1x256xf32>
    %15 = math.rsqrt %14 : vector<1x256xf32>
    %c0_6 = arith.constant 0 : index
    %c0_7 = arith.constant 0 : index
    %16 = vector.load %arg3[%c0_6, %c0_7] : memref<4x1xf32, #tpu.memory_space<vmem>>, vector<4x1xf32>
    %c0_8 = arith.constant 0 : index
    %c0_9 = arith.constant 0 : index
    %17 = vector.load %arg4[%c0_8, %c0_9] : memref<4x1xf32, #tpu.memory_space<vmem>>, vector<4x1xf32>
    %18 = vector.broadcast %15 : vector<1x256xf32> to vector<4x256xf32>
    %19 = arith.mulf %7, %18 : vector<4x256xf32>
    %20 = vector.broadcast %16 : vector<4x1xf32> to vector<4x256xf32>
    %21 = arith.mulf %19, %20 : vector<4x256xf32>
    %22 = vector.broadcast %17 : vector<4x1xf32> to vector<4x256xf32>
    %23 = arith.addf %21, %22 : vector<4x256xf32>
    %c0_10 = arith.constant 0 : index
    %c0_11 = arith.constant 0 : index
    %c0_12 = arith.constant 0 : index
    %24 = vector.load %arg5[%c0_10, %c0_11, %c0_12] : memref<1x4x256xf32, #tpu.memory_space<vmem>>, vector<1x4x256xf32>
    %25 = vector.shape_cast %24 : vector<1x4x256xf32> to vector<4x256xf32>
    %26 = vector.shape_cast %23 : vector<4x256xf32> to vector<1x4x256xf32>
    tpu.vector_store %arg5[%c0_10, %c0_11, %c0_12], %26 {strides = array<i32>} : memref<1x4x256xf32, #tpu.memory_space<vmem>>, vector<1x4x256xf32>,
    return
  }
  func.func @transform_0(%arg0: i32, %arg1: i32) -> (i32, i32, i32) {
    %c0_i32 = arith.constant 0 : i32
    %c0_i32_0 = arith.constant 0 : i32
    return %arg0, %c0_i32, %arg1 : i32, i32, i32
  }
  func.func @transform_1(%arg0: i32, %arg1: i32) -> (i32, i32) {
    %c0_i32 = arith.constant 0 : i32
    %c0_i32_0 = arith.constant 0 : i32
    %c0_i32_1 = arith.constant 0 : i32
    return %c0_i32, %c0_i32_0 : i32, i32
  }
  func.func @transform_2(%arg0: i32, %arg1: i32) -> (i32, i32) {
    %c0_i32 = arith.constant 0 : i32
    %c0_i32_0 = arith.constant 0 : i32
    %c0_i32_1 = arith.constant 0 : i32
    return %c0_i32, %c0_i32_0 : i32, i32
  }
  func.func @transform_3(%arg0: i32, %arg1: i32) -> (i32, i32, i32) {
    %c0_i32 = arith.constant 0 : i32
    %c0_i32_0 = arith.constant 0 : i32
    return %arg0, %c0_i32, %arg1 : i32, i32, i32
  }
}

</mosaic_0001>

<bundles_post_ra>
// kernel: tpu_custom_call.1
= control target key start
LH: loop header
LB: loop body
LE: loop exit
PB: predicated region body
PF: predicated region fallthrough
CT: control target
= control target key end

     0   :  { %8 = vsyncpa [#allocation3], 0  ;;  %s804_s0 = inlined_call_operand.hbm [shape: f32[2,4,256], index: 0, kind: input, shape index: {}]   ;;  %s805_s1 = inlined_call_operand.vmem [shape: f32[4,1], index: 1, kind: input, shape index: {}]   ;;  %s806_s2 = inlined_call_operand.vmem [shape: f32[4,1], index: 2, kind: input, shape index: {}]   ;;  %s807_s3 = inlined_call_operand.hbm [shape: f32[2,4,256], index: 3, kind: output, shape index: {}]  }
   0x1   :  { %10 = vsyncpa [#allocation3 + $0x1], 0 }
   0x2   :  { %11 = vsyncpa [#allocation4], 0 }
   0x3   :  { %13 = vsyncpa [#allocation4 + $0x1], 0  ;;  %s618_s12 = smov 0   ;;  %s620_s13 = smov 0  }
   0x4   :  { %s622_s14 = smov 0   ;;  %s624_s15 = smov 0  }
   0x5   :  { %s626_s16 = smov 0   ;;  %s628_s17 = smov 0  }
   0x6 LB: > { %s393_s18 = sadd.s32 4294967295, %s592_s17   ;;  %s394_s19 = sadd.s32 4294967294, %s592_s17   ;;  %s592_s17 = sphi %s628_s17, %s19_s17   ;;  %s588_s16 = sphi %s626_s16, %s823_s16   ;;  %s584_s15 = sphi %s624_s15, %s822_s15   ;;  %s580_s14 = sphi %s622_s14, %s821_s14   ;;  %s576_s13 = sphi %s620_s13, %s820_s13   ;;  %s572_s12 = sphi %s618_s12, %s819_s12  }
   0x7   : > { %s31_s20 = sadd.s32 1, %s588_s16  ;;  %s40_s21 = sadd.s32 1, %s580_s14 }
   0x8   : > { %p33_p0 = scmp.ge.s32.totalorder %s31_s20, 2  ;;  %p47_p1 = scmp.ne.s32.totalorder %s580_s14, %s576_s13 }
   0x9   : > { %p48_p2 = scmp.eq.s32.totalorder %s592_s17, 0  ;;  %p53_p3 = scmp.ne.s32.totalorder %s576_s13, %s572_s12 }
   0xa   : > { %s825_s20 = smov (%p33_p0, %s31_s20), 0  ;;  %p54_p5 = scmp.eq.s32.totalorder %s393_s18, 0 }
   0xb   : > { %p659_p4 = por %p48_p2, %p47_p1  ;;  %s35_s23 = ssub.s32 %s588_s16, %s825_s20 }
   0xc   : > { %p121_p6 = scmp.eq.s32.totalorder %s393_s18, 1  ;;  %p38_p7 = scmp.eq.s32.totalorder %s35_s23, 0 }
   0xd   : > { %p665_p8 = por %p54_p5, %p53_p3  ;;  %p127_p10 = scmp.eq.s32.totalorder %s394_s19, 1 }
   0xe   : > { %p669_p9 = por %p121_p6, %p47_p1  ;;  %p422_p13 = scmp.lt.s32.totalorder %s592_s17, 2 }
   0xf   : > { %s674_s26 = scalar_select %p38_p7, %s580_s14, %s40_s21  }
  0x10   : > { %s811_s25 = scalar_select %p669_p9, 1, 0 }
  0x11   : > { %p676_p11 = por %p127_p10, %p53_p3  ;;  %s153_s28 = sand.u32 1, %s580_s14  }
  0x12   : > { %s397_s29 = sshll.u32 %s153_s28, 3  ;;  %s408_s30 = sshll.u32 %s588_s16, 7 }
  0x13   : > { %s812_s27 = scalar_select %p676_p11, 1, 0 }
  0x14   : > { %s687_s6 = scalar_lea.hbm %s804_s0, %s408_s30  ;;  %s157_s7 = scalar_lea.vmem [#allocation2], %s397_s29 }
  0x15   : > { %s167_s8 = sshll.u32 %s157_s7, 4  ;;  %p693_p0 = pnand %p422_p13, %p659_p4  ;;  %s689_s8 = int_to_ptr.vmem [resolvable:$true] %s167_s8 }
  0x16   : > { %s154_s10 = scalar_lea.sflag [#allocation3], %s153_s28  ;;  %s480_s11 = scalar_lea.hbm %s687_s6, 128 }
  0x17   : > { %p481_p3 = scmp.ne.s32.totalorder %s687_s6, %s480_s11  ;;  %p482_p5 = pneg %p693_p0 }
  0x18   : > { %s485_s21 = scalar_lea.hbm %s804_s0, 256  ;;  %p486_p4 = scmp.lt.u32.totalorder %s687_s6, %s804_s0 }
  0x19   : > { %p483_p6 = pnand %p482_p5, %p481_p3  ;;  %p487_p10 = scmp.lt.u32.totalorder %s485_s21, %s480_s11 }
  0x1a   : > { %p489_p12 = scmp.lt.u32.totalorder %s480_s11, %s687_s6 }
  0x1b   : > { %p484_p7 = pneg %p483_p6  ;;  %p488_p13 = por %p487_p10, %p486_p4 }
  0x1d   : > { %p490_p1 = por %p489_p12, %p488_p13 }
  0x1f   : > { %p491_p2 = pnand %p490_p1, %p484_p7 }
  0x21   : > { %494 = shalt.err (!%p491_p2)
}
  0x22   : > { %s495_s28 = scalar_lea.vmem %s689_s8, 128  ;;  %s594_s29 = smov [#allocation2]  }
  0x23   : > { %p496_p3 = scmp.ne.s32.totalorder %s689_s8, %s495_s28  ;;  %s500_s30 = sshll.u32 %s594_s29, 4  ;;  %s501_s30 = int_to_ptr.vmem [resolvable:$false] %s500_s30 }
  0x24   : > { %s502_s4 = scalar_lea.vmem %s501_s30, 256  ;;  %p503_p9 = scmp.lt.s32.totalorder %s689_s8, %s501_s30 }
  0x25   : > { %p498_p6 = pnand %p496_p3, %p482_p5  ;;  %p504_p4 = scmp.lt.s32.totalorder %s502_s4, %s495_s28 }
  0x27   : > { %p499_p11 = pneg %p498_p6  ;;  %p505_p10 = por %p504_p4, %p503_p9 }
  0x29   : > { %p506_p12 = pnand %p505_p10, %p499_p11 }
  0x2b   : > { %509 = shalt.err (!%p506_p12)
}
  0x2c   : > { %417 = dma.hbm_to_vmem [thread:$0]  (!%p693_p0), %s687_s6, 128, %s689_s8, %s154_s10  }
  0x2d   : > { %p814_p1 = scmp.lt.s32.totalorder %s592_s17, 3  ;;  %p815_p2 = scmp.ge.s32.totalorder %s592_s17, 1 }
  0x2f   : > { %p173_p5 = pnand %p815_p2, %p814_p1 }
  0x30   : > { %s729_s5 = sand.u32 (!%p173_p5), 1, %s576_s13  }
  0x31   : > { %176 = sbr.rel (%p173_p5) target bundleno = 209 (0xd1), region = 32  ;;  %s401_s7 = sshll.u32 (!%p173_p5), %s729_s5, 3 }
  0x32   : > { %s179_s11 = scalar_lea.sflag (!%p173_p5), [#allocation3], %s729_s5  ;;  %s182_s9 = scalar_lea.vmem (!%p173_p5), [#allocation2], %s401_s7 }
  0x38   : > { %563 = dma.done.wait (%p665_p8), %s179_s11, 128  }
  0x39   : > { %565 = vsyncadd (%p665_p8), %s179_s11, 4294967168  ;;  %v595_v0 = vmov 0   ;;  %v258_v1 = vld [vmem:[%s805_s1] sm:$0xf]  ;;  %vm211_vm0 = vcmask 1043456   ;;  %v272_v45 = vlaneseq  ;;  %s409_s24 = sshll.u32 %s584_s15, 7 }
  0x3a   : > { %474 = vset.pattern.permute.xlu0 %v595_v0  ;;  %v259_v2 = vld [vmem:[%s806_s2] sm:$0xf]  ;;  %v596_v43 = vmov 839922192   ;;  %s204_s19 = scalar_lea.vmem [#allocation5], %s401_s7  ;;  %s755_s28 = scalar_lea.hbm %s807_s3, %s409_s24 }
  0x3b   : > { %267 = vperm.xlu0 %474, %v258_v1   ;;  %v207_v3 = vld [vmem:[%s182_s9] sm:$0xff]  ;;  %v270_v44 = vunpack.c.l.s4 %v596_v43  ;;  %v273_v48 = vshrl.u32 %v272_v45, 7  ;;  %s309_s21 = sshll.u32 %s204_s19, 4  ;;  %s293_s29 = scalar_lea.sflag [#allocation4], %s729_s5  ;;  %s757_s21 = int_to_ptr.vmem [resolvable:$true] %s309_s21 }
  0x3c   : > { %v209_v4 = vcombine.high %v207_v3, %v207_v3  ;;  %v212_v5 = vsel %vm211_vm0, %v207_v3, 0.0  ;;  %s510_s30 = scalar_lea.vmem %s757_s21, 128  ;;  %p816_p9 = scmp.ne.s32.totalorder %s811_s25, 0 }
  0x3d   : > { %v213_v7 = vrot.slane %v212_v5, 4  ;;  %v271_v47 = vunpack.c.0.s8 %v270_v44  ;;  %p511_p8 = scmp.ne.s32.totalorder %s757_s21, %s510_s30  ;;  %s597_s15 = smov [#allocation5]  }
  0x3e   : > { %v219_v6 = vsel %vm211_vm0, %v209_v4, 0.0  ;;  %s514_s4 = sshll.u32 %s597_s15, 4  ;;  %s515_s4 = int_to_ptr.vmem [resolvable:$false] %s514_s4 }
  0x3f   : > { %280 = vperm.xlu0 %474, %v259_v2   ;;  %v220_v8 = vrot.slane %v219_v6, 4  ;;  %v214_v9 = vadd.f32 %v213_v7, %v212_v5  ;;  %v274_v50 = vsub.s32 %v271_v47, %v273_v48  ;;  %p512_p11 = pnand %p511_p8, %p816_p9  ;;  %s516_s7 = scalar_lea.vmem %s515_s4, 256 }
  0x40   : > { %p517_p7 = scmp.lt.s32.totalorder %s757_s21, %s515_s4  ;;  %p518_p13 = scmp.lt.s32.totalorder %s516_s7, %s510_s30 }
  0x41   : > { %v221_v10 = vadd.f32 %v220_v8, %v219_v6  ;;  %v215_v11 = vrot.slane %v214_v9, 2  ;;  %p513_p0 = pneg %p512_p11 }
  0x42   : > { %p519_p3 = por %p518_p13, %p517_p7 }
  0x43   : > { %v222_v12 = vrot.slane %v221_v10, 2  ;;  %v216_v13 = vadd.f32 %v215_v11, %v214_v9 }
  0x44   : > { %p520_p6 = pnand %p519_p3, %p513_p0 }
  0x45   : > { %v223_v14 = vadd.f32 %v222_v12, %v221_v10  ;;  %v217_v15 = vrot.slane %v216_v13, 1 }
  0x47   : > { %v224_v16 = vrot.slane %v223_v14, 1  ;;  %v218_v17 = vadd.f32 %v217_v15, %v216_v13 }
  0x49   : > { %v225_v18 = vadd.f32 %v224_v16, %v223_v14  ;;  %v227_v19 = vmul.f32 0.25, %v218_v17 }
  0x4b   : > { %v228_v20 = vmul.f32 0.25, %v225_v18 }
  0x4d   : > { %v231_v21 = vcombine.low %v227_v19, %v228_v20 }
  0x4f   : > { %v233_v22 = vsub.f32 %v207_v3, %v231_v21 }
  0x51   : > { %v234_v23 = vmul.f32 %v233_v22, %v233_v22 }
  0x53   : > { %v236_v24 = vcombine.high %v234_v23, %v234_v23  ;;  %v238_v25 = vsel %vm211_vm0, %v234_v23, 0.0 }
  0x54   : > { %v239_v27 = vrot.slane %v238_v25, 4 }
  0x55   : > { %v245_v26 = vsel %vm211_vm0, %v236_v24, 0.0 }
  0x56   : > { %v246_v28 = vrot.slane %v245_v26, 4  ;;  %v240_v29 = vadd.f32 %v239_v27, %v238_v25 }
  0x58   : > { %v247_v30 = vadd.f32 %v246_v28, %v245_v26  ;;  %v241_v31 = vrot.slane %v240_v29, 2 }
  0x5a   : > { %v248_v32 = vrot.slane %v247_v30, 2  ;;  %v242_v33 = vadd.f32 %v241_v31, %v240_v29 }
  0x5c   : > { %v249_v34 = vadd.f32 %v248_v32, %v247_v30  ;;  %v243_v35 = vrot.slane %v242_v33, 1 }
  0x5e   : > { %v250_v36 = vrot.slane %v249_v34, 1  ;;  %v244_v37 = vadd.f32 %v243_v35, %v242_v33 }
  0x60   : > { %v251_v38 = vadd.f32 %v250_v36, %v249_v34  ;;  %v252_v39 = vmul.f32 0.25, %v244_v37 }
  0x62   : > { %v253_v40 = vmul.f32 0.25, %v251_v38  ;;  %v254_v41 = vadd.f32 1e-06, %v252_v39 }
  0x64   : > { %v255_v42 = vadd.f32 1e-06, %v253_v40  ;;  %476 = vrsqrt.f32 %v254_v41 }
  0x66   : > { %478 = vrsqrt.f32 %v255_v42 }
  0x6e   : > { %v477_v46 = vpop.eup %476 }
  0x70   : > { %v479_v49 = vpop.eup %478 }
  0x71   : > { %v262_v51 = vcombine.low %v477_v46, %v479_v49 }
  0x73   : > { %v264_v53 = vmul.f32 %v262_v51, %v233_v22 }
  0xba   : > { %v268_v52 = vpop.permute.xlu0 %267 }
  0xbb   : > { %v275_v54 = vrot.slane %v268_v52, %v274_v50 }
  0xbd   : > { %v277_v56 = vmul.f32 %v275_v54, %v264_v53 }
  0xbe   : > { %v281_v55 = vpop.permute.xlu0 %280 }
  0xbf   : > { %v288_v57 = vrot.slane %v281_v55, %v274_v50 }
  0xc1   : > { %v290_v58 = vadd.f32 %v288_v57, %v277_v56 }
  0xc3   : > { %291 = vst [vmem:[%s204_s19] sm:$0xff] %v290_v58 }
  0xc4   : > { %523 = shalt.err (!%p520_p6)
}
  0xc5   : > { %s524_s5 = scalar_lea.hbm %s755_s28, 128  ;;  %s528_s6 = scalar_lea.hbm %s807_s3, 256 }
  0xc6   : > { %p525_p4 = scmp.ne.s32.totalorder %s755_s28, %s524_s5  ;;  %p529_p1 = scmp.lt.u32.totalorder %s755_s28, %s807_s3 }
  0xc7   : > { %p530_p2 = scmp.lt.u32.totalorder %s528_s6, %s524_s5  ;;  %p532_p8 = scmp.lt.u32.totalorder %s524_s5, %s755_s28 }
  0xc8   : > { %p526_p10 = pnand %p525_p4, %p816_p9 }
  0xc9   : > { %p531_p5 = por %p530_p2, %p529_p1 }
  0xca   : > { %p527_p12 = pneg %p526_p10 }
  0xcb   : > { %p533_p11 = por %p532_p8, %p531_p5 }
  0xcd   : > { %p534_p0 = pnand %p533_p11, %p527_p12 }
  0xcf   : > { %537 = shalt.err (!%p534_p0)
}
  0xd0   : > { %412 = dma.vmem_to_hbm [thread:$0]  (%p816_p9), %s757_s21, 128, %s755_s28, %s293_s29  }
  0xd1 PF: > { %s321_s18 = sand.u32 1, %s572_s12   ;;  %p817_p7 = scmp.ne.s32.totalorder %s812_s27, 0 }
  0xd2   : > { %p818_p13 = scmp.ge.s32.totalorder %s592_s17, 2  ;;  %s322_s24 = scalar_lea.sflag [#allocation4], %s321_s18 }
  0xd4   : > { %p419_p3 = pnand %p818_p13, %p817_p7 }
  0xd6   : > { %567 = dma.done.wait (!%p419_p3), %s322_s24, 128  }
  0xd7   : > { %569 = vsyncadd (!%p419_p3), %s322_s24, 4294967168  ;;  %s19_s17 = sadd.s32 1, %s592_s17   ;;  %s819_s12 = smov %s576_s13 }
  0xd8   : > { %p16_p6 = scmp.ge.s32.totalorder %s19_s17, 4   ;;  %s820_s13 = smov %s580_s14 }
  0xd9   : > { %s821_s14 = smov %s674_s26  ;;  %s822_s15 = smov %s588_s16 }
  0xda   : > { %s823_s16 = smov %s825_s20  ;;  %18 = sbr.rel (!%p16_p6) target bundleno = 6 (0x6), region = 77 }
  0xe1   :  { %327 = vsyncpa [#allocation3], 1 }
  0xe2   :  { %329 = vsyncpa [#allocation3 + $0x1], 1 }
  0xe3   :  { %330 = vsyncpa [#allocation4], 1 }
  0xe4   :  { %332 = vsyncpa [#allocation4 + $0x1], 1 }

</bundles_post_ra>
